<compile_context>
chip_gen: v7x
topology: tpu7x:2x2x1
jax: 0.10.0
libtpu: 0.0.40
codegen_flags: <defaults>
</compile_context>

<pallas_src>
import jax
import jax.numpy as jnp
from jax.experimental import pallas as pl
from jax.experimental.pallas import tpu as pltpu

HIDDEN = 256      # matches `hidden = 256` in the reference script
VOCAB = 512       # vocab_size; multiple of 128 -> lane-dense output store
BATCH = 2
SEQ = 8


# ------------------------------- kernel --------------------------------------
def mlm_head_kernel(x_ref, w_ref, b_ref, o_ref):
    # x_ref: (TM, H) bf16, w_ref: (H, V) bf16, b_ref: (1, V) f32, o_ref: (TM, V) f32
    logits = jnp.dot(x_ref[...], w_ref[...],
                     preferred_element_type=jnp.float32) + b_ref[...]
    # numerically-stable log_softmax over the vocab (last/lane) axis, all f32
    m = jnp.max(logits, axis=-1, keepdims=True)
    z = logits - m
    lse = jnp.log(jnp.sum(jnp.exp(z), axis=-1, keepdims=True))
    o_ref[...] = (z - lse).astype(o_ref.dtype)


# ------------------------------- wrapper --------------------------------------
def masked_language_model(x, w, b, *, max_rows_per_block=1024):
    """log_softmax(x @ w + b, axis=-1) fused into a single pallas_call.

    x: (..., H) activations; w: (H, V) (transposed torch Linear weight);
    b: (V,) or (1, V). Returns (..., V) log-probabilities in float32.
    """
    lead = x.shape[:-1]
    H = x.shape[-1]
    V = w.shape[-1]

    xf = x.reshape(-1, H)
    M = xf.shape[0]

    # bf16 inputs to the MXU (halves weight HBM traffic); accumulation and all
    # softmax math stay f32 inside the kernel.
    xf_bf = xf.astype(jnp.bfloat16)
    w_bf = w.astype(jnp.bfloat16)
    b_f32 = jnp.asarray(b, jnp.float32).reshape(1, V)

    # Row tiling: for small M (the case here) use one full block / one grid
    # step (block_shape == full array dims is always legal, so no padding or
    # slicing is ever materialized).  Only very large, 8-divisible M gets a
    # multi-step row loop; weights/bias are grid-invariant and never re-DMA'd.
    if M <= max_rows_per_block or M % 8 != 0:
        row_tile = M
    else:
        row_tile = max_rows_per_block
        while M % row_tile != 0:
            row_tile -= 8
    grid = (M // row_tile,)

    out = pl.pallas_call(
        mlm_head_kernel,
        out_shape=jax.ShapeDtypeStruct((M, V), jnp.float32),
        grid=grid,
        in_specs=[
            pl.BlockSpec((row_tile, H), lambda i: (i, 0)),
            pl.BlockSpec((H, V), lambda i: (0, 0)),   # grid-invariant weights
            pl.BlockSpec((1, V), lambda i: (0, 0)),   # grid-invariant bias
        ],
        out_specs=pl.BlockSpec((row_tile, V), lambda i: (i, 0)),
        compiler_params=pltpu.CompilerParams(
            dimension_semantics=("arbitrary",)),
    )(xf_bf, w_bf, b_f32)

    return out.reshape(*lead, V)


# --------------------------------- main ---------------------------------------
if __name__ == "__main__":
    key = jax.random.PRNGKey(0)
    kx, kw, kb = jax.random.split(key, 3)

    # Deterministic small inputs consistent with the module's forward.
    x = jax.random.normal(kx, (BATCH, SEQ, HIDDEN), jnp.float32)
    # torch nn.Linear(hidden, vocab): weight (V, H); stored here as (H, V).
    w = 0.02 * jax.random.normal(kw, (HIDDEN, VOCAB), jnp.float32)
    b = 0.02 * jax.random.normal(kb, (VOCAB,), jnp.float32)

    out = masked_language_model(x, w, b)
    jax.block_until_ready(out)

    assert out.shape == (BATCH, SEQ, VOCAB)
    assert bool(jnp.all(jnp.isfinite(out)))

    # Tight check: reference with identical bf16 input quantization.
    xq = x.astype(jnp.bfloat16).astype(jnp.float32)
    wq = w.astype(jnp.bfloat16).astype(jnp.float32)
    ref_q = jax.nn.log_softmax(jnp.einsum("bsh,hv->bsv", xq, wq) + b, axis=-1)
    assert bool(jnp.allclose(out, ref_q, atol=1e-3, rtol=1e-3))

    # Loose check against the full-f32 reference (end-to-end semantics).
    ref = jax.nn.log_softmax(jnp.einsum("bsh,hv->bsv", x, w) + b, axis=-1)
    assert bool(jnp.allclose(out, ref, atol=5e-2, rtol=0))

    print("KERNEL_OK")
</pallas_src>

<mosaic_0001>
module attributes {stable_mosaic.version = 11 : i64} {
  func.func @mlm_head_kernel(%arg0: i32, %arg1: memref<16x256xbf16, #tpu.memory_space<vmem>>, %arg2: memref<256x512xbf16, #tpu.memory_space<vmem>>, %arg3: memref<1x512xf32, #tpu.memory_space<vmem>>, %arg4: memref<16x512xf32, #tpu.memory_space<vmem>>) attributes {dimension_semantics = [#tpu.dimension_semantics<arbitrary>], iteration_bounds = array<i64: 1>, scalar_prefetch = 0 : i64, scratch_operands = 0 : i64, tpu.core_type = #tpu.core_type<tc>, window_params = [{transform_indices = @transform_0, window_bounds = array<i64: 16, 256>}, {pipeline_mode = #tpu.pipeline_mode<synchronous>, transform_indices = @transform_1, window_bounds = array<i64: 256, 512>}, {pipeline_mode = #tpu.pipeline_mode<synchronous>, transform_indices = @transform_2, window_bounds = array<i64: 1, 512>}, {transform_indices = @transform_3, window_bounds = array<i64: 16, 512>}]} {
    %c0 = arith.constant 0 : index
    %c0_0 = arith.constant 0 : index
    %0 = vector.load %arg1[%c0, %c0_0] : memref<16x256xbf16, #tpu.memory_space<vmem>>, vector<16x256xbf16>
    %c0_1 = arith.constant 0 : index
    %c0_2 = arith.constant 0 : index
    %1 = vector.load %arg2[%c0_1, %c0_2] : memref<256x512xbf16, #tpu.memory_space<vmem>>, vector<256x512xbf16>
    %cst = arith.constant dense<0.000000e+00> : vector<16x512xf32>
    %2 = tpu.matmul %0, %1, %cst {dimension_numbers = #tpu.dot_dimension_numbers<[1], [0], [0], [1], [0, 0, 1, 1], [], []>} : vector<16x256xbf16>, vector<256x512xbf16>, vector<16x512xf32> -> vector<16x512xf32>
    %c0_3 = arith.constant 0 : index
    %c0_4 = arith.constant 0 : index
    %3 = vector.load %arg3[%c0_3, %c0_4] : memref<1x512xf32, #tpu.memory_space<vmem>>, vector<1x512xf32>
    %4 = vector.broadcast %3 : vector<1x512xf32> to vector<16x512xf32>
    %5 = arith.addf %2, %4 : vector<16x512xf32>
    %cst_5 = arith.constant dense<0xFF800000> : vector<16xf32>
    %6 = vector.multi_reduction <maximumf>, %5, %cst_5 [1] : vector<16x512xf32> to vector<16xf32>
    %7 = vector.shape_cast %6 : vector<16xf32> to vector<16x1xf32>
    %8 = vector.broadcast %7 : vector<16x1xf32> to vector<16x512xf32>
    %9 = arith.subf %5, %8 : vector<16x512xf32>
    %10 = math.exp %9 : vector<16x512xf32>
    %cst_6 = arith.constant dense<0.000000e+00> : vector<16xf32>
    %11 = vector.multi_reduction <add>, %10, %cst_6 [1] : vector<16x512xf32> to vector<16xf32>
    %12 = vector.shape_cast %11 : vector<16xf32> to vector<16x1xf32>
    %13 = math.log %12 : vector<16x1xf32>
    %14 = vector.broadcast %13 : vector<16x1xf32> to vector<16x512xf32>
    %15 = arith.subf %9, %14 : vector<16x512xf32>
    %c0_7 = arith.constant 0 : index
    %c0_8 = arith.constant 0 : index
    %16 = vector.load %arg4[%c0_7, %c0_8] : memref<16x512xf32, #tpu.memory_space<vmem>>, vector<16x512xf32>
    tpu.vector_store %arg4[%c0_7, %c0_8], %15 {strides = array<i32>} : memref<16x512xf32, #tpu.memory_space<vmem>>, vector<16x512xf32>,
    return
  }
  func.func @transform_0(%arg0: i32) -> (i32, i32) {
    %c0_i32 = arith.constant 0 : i32
    %c0_i32_0 = arith.constant 0 : i32
    return %arg0, %c0_i32 : i32, i32
  }
  func.func @transform_1(%arg0: i32) -> (i32, i32) {
    %c0_i32 = arith.constant 0 : i32
    %c0_i32_0 = arith.constant 0 : i32
    %c0_i32_1 = arith.constant 0 : i32
    return %c0_i32, %c0_i32_0 : i32, i32
  }
  func.func @transform_2(%arg0: i32) -> (i32, i32) {
    %c0_i32 = arith.constant 0 : i32
    %c0_i32_0 = arith.constant 0 : i32
    %c0_i32_1 = arith.constant 0 : i32
    return %c0_i32, %c0_i32_0 : i32, i32
  }
  func.func @transform_3(%arg0: i32) -> (i32, i32) {
    %c0_i32 = arith.constant 0 : i32
    %c0_i32_0 = arith.constant 0 : i32
    return %arg0, %c0_i32 : i32, i32
  }
}

</mosaic_0001>

<bundles_post_ra>
// kernel: tpu_custom_call.1
= control target key start
LH: loop header
LB: loop body
LE: loop exit
PB: predicated region body
PF: predicated region fallthrough
CT: control target
= control target key end

     0   :  { %8 = vsyncpa [#allocation3], 0  ;;  %s963_s0 = inlined_call_operand.hbm [shape: bf16[16,256], index: 0, kind: input, shape index: {}]   ;;  %s964_s1 = inlined_call_operand.hbm [shape: bf16[256,512], index: 1, kind: input, shape index: {}]   ;;  %s965_s2 = inlined_call_operand.vmem [shape: f32[1,512], index: 2, kind: input, shape index: {}]   ;;  %s966_s3 = inlined_call_operand.hbm [shape: f32[16,512], index: 3, kind: output, shape index: {}]  }
   0x1   :  { %9 = vsyncpa [#allocation6], 0 }
   0x2   :  { %10 = vsyncpa [#allocation4], 0  ;;  %s895_s12 = smov [#allocation2]   ;;  %s823_s16 = scalar_lea.hbm %s963_s0, 256 }
   0x3   :  { %s16_s13 = sshll.u32 %s895_s12, 4  ;;  %p824_p0 = scmp.ne.s32.totalorder %s963_s0, %s823_s16  ;;  %s17_s13 = int_to_ptr.vmem [resolvable:$true] %s16_s13 }
   0x4   :  { %p827_p1 = scmp.lt.u32.totalorder %s823_s16, %s963_s0 }
   0x6   :  { %p829_p2 = pnand %p827_p1, %p824_p0 }
   0x8   :  { %832 = shalt.err (!%p829_p2)
}
   0x9   :  { %s833_s21 = scalar_lea.vmem %s17_s13, 256  ;;  %p838_p4 = scmp.lt.s32.totalorder %s17_s13, %s17_s13 }
   0xa   :  { %p834_p3 = scmp.ne.s32.totalorder %s17_s13, %s833_s21  ;;  %p839_p5 = scmp.lt.s32.totalorder %s833_s21, %s833_s21 }
   0xc   :  { %p840_p6 = por %p839_p5, %p838_p4 }
   0xe   :  { %p841_p7 = pnand %p840_p6, %p834_p3 }
  0x10   :  { %844 = shalt.err (!%p841_p7)
}
  0x11   :  { %s896_s22 = smov 128   ;;  %s897_s23 = smov 8  }
  0x12   :  { %22 = dma.hbm_to_vmem [thread:$0]  %s963_s0, 256, %s17_s13, [#allocation3], %s896_s22, %s896_s22, %s897_s23  }
  0x13   :  { %s898_s26 = smov [#allocation5]   ;;  %s845_s30 = scalar_lea.hbm %s964_s1, 8192 }
  0x14   :  { %s28_s27 = sshll.u32 %s898_s26, 4  ;;  %p846_p8 = scmp.ne.s32.totalorder %s964_s1, %s845_s30  ;;  %s29_s27 = int_to_ptr.vmem [resolvable:$true] %s28_s27 }
  0x15   :  { %p849_p9 = scmp.lt.u32.totalorder %s845_s30, %s964_s1 }
  0x17   :  { %p851_p10 = pnand %p849_p9, %p846_p8 }
  0x19   :  { %854 = shalt.err (!%p851_p10)
}
  0x1a   :  { %s855_s8 = scalar_lea.vmem %s29_s27, 8192  ;;  %p860_p12 = scmp.lt.s32.totalorder %s29_s27, %s29_s27 }
  0x1b   :  { %p856_p11 = scmp.ne.s32.totalorder %s29_s27, %s855_s8  ;;  %p861_p13 = scmp.lt.s32.totalorder %s855_s8, %s855_s8 }
  0x1d   :  { %p862_p0 = por %p861_p13, %p860_p12 }
  0x1f   :  { %p863_p1 = pnand %p862_p0, %p856_p11 }
  0x21   :  { %866 = shalt.err (!%p863_p1)
}
  0x22   :  { %s899_s0 = smov 256   ;;  %s900_s9 = smov 16  }
  0x23   :  { %34 = dma.hbm_to_vmem [thread:$0]  %s964_s1, 8192, %s29_s27, [#allocation6], %s899_s0, %s899_s0, %s900_s9  }
  0x24   :  { %889 = dma.done.wait [#allocation3], 256  }
  0x25   :  { %890 = vsyncadd [#allocation3], 4294967040 }
  0x26   :  { %891 = dma.done.wait [#allocation6], 8192  }
  0x27   :  { %892 = vsyncadd [#allocation6], 4294959104  ;;  %v704_v0 = vld [vmem:[#allocation5 + $0x4] ss:$16 sps:$4 sm:$0xff]   ;;  %v706_v1 = vld [vmem:[#allocation5 + $0xc] ss:$16 sps:$4 sm:$0xff]  }
  0x28   :  { %461 = vmatprep.subr.bf16.mxu0 %v704_v0  ;;  %v708_v2 = vld [vmem:[#allocation5] ss:$16 sps:$4 sm:$0xff]   ;;  %v709_v3 = vld [vmem:[#allocation5 + $0x8] ss:$16 sps:$4 sm:$0xff]   ;;  %504 = vmatprep.subr.bf16.mxu1 %v706_v1  ;;  %v710_v4 = vld [vmem:[#allocation5 + $0x24] ss:$16 sps:$4 sm:$0xff]  }
  0x29   :  { %462 = vmatpush1.bf16.msra.mxu0 %v708_v2  ;;  %505 = vmatpush1.bf16.msra.mxu1 %v709_v3  ;;  %v712_v5 = vld [vmem:[#allocation5 + $0x2c] ss:$16 sps:$4 sm:$0xff]   ;;  %v714_v6 = vld [vmem:[#allocation5 + $0x20] ss:$16 sps:$4 sm:$0xff]   ;;  %v715_v7 = vld [vmem:[#allocation5 + $0x28] ss:$16 sps:$4 sm:$0xff]   ;;  %v111_v2 = vlaneseq }
  0x2a   :  { %463 = vmatprep.subr.bf16.mxu0 %v710_v4  ;;  %506 = vmatprep.subr.bf16.mxu1 %v712_v5  ;;  %v716_v8 = vld [vmem:[#allocation5 + $0x44] ss:$16 sps:$4 sm:$0xff]   ;;  %v718_v9 = vld [vmem:[#allocation5 + $0x4c] ss:$16 sps:$4 sm:$0xff]   ;;  %v720_v10 = vld [vmem:[#allocation5 + $0x40] ss:$16 sps:$4 sm:$0xff]  }
  0x2b   :  { %v721_v11 = vld [vmem:[#allocation5 + $0x48] ss:$16 sps:$4 sm:$0xff]   ;;  %v722_v12 = vld [vmem:[#allocation5 + $0x64] ss:$16 sps:$4 sm:$0xff]   ;;  %v724_v13 = vld [vmem:[#allocation5 + $0x6c] ss:$16 sps:$4 sm:$0xff]  }
  0x2c   :  { %v726_v14 = vld [vmem:[#allocation5 + $0x60] ss:$16 sps:$4 sm:$0xff]   ;;  %v727_v15 = vld [vmem:[#allocation5 + $0x68] ss:$16 sps:$4 sm:$0xff]   ;;  %v728_v16 = vld [vmem:[#allocation5 + $0x84] ss:$16 sps:$4 sm:$0xff]  }
  0x2d   :  { %464 = vmatpush1.bf16.msra.mxu0 %v714_v6  ;;  %507 = vmatpush1.bf16.msra.mxu1 %v715_v7  ;;  %v730_v17 = vld [vmem:[#allocation5 + $0x8c] ss:$16 sps:$4 sm:$0xff]   ;;  %v732_v18 = vld [vmem:[#allocation5 + $0x80] ss:$16 sps:$4 sm:$0xff]   ;;  %v733_v19 = vld [vmem:[#allocation5 + $0x88] ss:$16 sps:$4 sm:$0xff]  }
  0x2e   :  { %465 = vmatprep.subr.bf16.mxu0 %v716_v8  ;;  %508 = vmatprep.subr.bf16.mxu1 %v718_v9  ;;  %v734_v20 = vld [vmem:[#allocation5 + $0xa4] ss:$16 sps:$4 sm:$0xff]   ;;  %v736_v21 = vld [vmem:[#allocation5 + $0xac] ss:$16 sps:$4 sm:$0xff]   ;;  %v738_v22 = vld [vmem:[#allocation5 + $0xa0] ss:$16 sps:$4 sm:$0xff]  }
  0x2f   :  { %v739_v23 = vld [vmem:[#allocation5 + $0xa8] ss:$16 sps:$4 sm:$0xff]   ;;  %v740_v24 = vld [vmem:[#allocation5 + $0xc4] ss:$16 sps:$4 sm:$0xff]   ;;  %v742_v25 = vld [vmem:[#allocation5 + $0xcc] ss:$16 sps:$4 sm:$0xff]  }
  0x30   :  { %v744_v26 = vld [vmem:[#allocation5 + $0xc0] ss:$16 sps:$4 sm:$0xff]   ;;  %v745_v27 = vld [vmem:[#allocation5 + $0xc8] ss:$16 sps:$4 sm:$0xff]   ;;  %v746_v28 = vld [vmem:[#allocation5 + $0xe4] ss:$16 sps:$4 sm:$0xff]  }
  0x31   :  { %466 = vmatpush1.bf16.msra.mxu0 %v720_v10  ;;  %509 = vmatpush1.bf16.msra.mxu1 %v721_v11  ;;  %v748_v29 = vld [vmem:[#allocation5 + $0xec] ss:$16 sps:$4 sm:$0xff]   ;;  %v750_v30 = vld [vmem:[#allocation5 + $0xe0] ss:$16 sps:$4 sm:$0xff]   ;;  %v751_v31 = vld [vmem:[#allocation5 + $0xe8] ss:$16 sps:$4 sm:$0xff]  }
  0x32   :  { %467 = vmatprep.subr.bf16.mxu0 %v722_v12  ;;  %510 = vmatprep.subr.bf16.mxu1 %v724_v13  ;;  %v752_v32 = vld [vmem:[#allocation5 + $0x104] ss:$16 sps:$4 sm:$0xff]   ;;  %v754_v33 = vld [vmem:[#allocation5 + $0x10c] ss:$16 sps:$4 sm:$0xff]   ;;  %v756_v34 = vld [vmem:[#allocation5 + $0x100] ss:$16 sps:$4 sm:$0xff]  }
  0x33   :  { %v757_v35 = vld [vmem:[#allocation5 + $0x108] ss:$16 sps:$4 sm:$0xff]   ;;  %v758_v36 = vld [vmem:[#allocation5 + $0x124] ss:$16 sps:$4 sm:$0xff]   ;;  %v760_v37 = vld [vmem:[#allocation5 + $0x12c] ss:$16 sps:$4 sm:$0xff]  }
  0x34   :  { %v762_v38 = vld [vmem:[#allocation5 + $0x120] ss:$16 sps:$4 sm:$0xff]   ;;  %v763_v39 = vld [vmem:[#allocation5 + $0x128] ss:$16 sps:$4 sm:$0xff]   ;;  %v764_v40 = vld [vmem:[#allocation5 + $0x144] ss:$16 sps:$4 sm:$0xff]  }
  0x35   :  { %468 = vmatpush1.bf16.msra.mxu0 %v726_v14  ;;  %511 = vmatpush1.bf16.msra.mxu1 %v727_v15  ;;  %v766_v41 = vld [vmem:[#allocation5 + $0x14c] ss:$16 sps:$4 sm:$0xff]   ;;  %v768_v42 = vld [vmem:[#allocation5 + $0x140] ss:$16 sps:$4 sm:$0xff]   ;;  %v769_v43 = vld [vmem:[#allocation5 + $0x148] ss:$16 sps:$4 sm:$0xff]  }
  0x36   :  { %469 = vmatprep.subr.bf16.mxu0 %v728_v16  ;;  %512 = vmatprep.subr.bf16.mxu1 %v730_v17  ;;  %v770_v44 = vld [vmem:[#allocation5 + $0x164] ss:$16 sps:$4 sm:$0xff]   ;;  %v772_v45 = vld [vmem:[#allocation5 + $0x16c] ss:$16 sps:$4 sm:$0xff]   ;;  %v774_v47 = vld [vmem:[#allocation5 + $0x160] ss:$16 sps:$4 sm:$0xff]  }
  0x37   :  { %v802_v46 = vld [vmem:[#allocation2 + $0x4] ss:$8 sps:$4 sm:$0xff]   ;;  %v775_v48 = vld [vmem:[#allocation5 + $0x168] ss:$16 sps:$4 sm:$0xff]   ;;  %v780_v51 = vld [vmem:[#allocation5 + $0x180] ss:$16 sps:$4 sm:$0xff]  }
  0x38   :  { %v776_v49 = vld [vmem:[#allocation5 + $0x184] ss:$16 sps:$4 sm:$0xff]   ;;  %v778_v50 = vld [vmem:[#allocation5 + $0x18c] ss:$16 sps:$4 sm:$0xff]   ;;  %493 = vmatprep.mubr.bf16.mxu0 %v802_v46  ;;  %536 = vmatprep.mubr.bf16.mxu1 %v802_v46  ;;  %v781_v52 = vld [vmem:[#allocation5 + $0x188] ss:$16 sps:$4 sm:$0xff]  }
  0x39   :  { %470 = vmatpush1.bf16.msra.mxu0 %v732_v18  ;;  %513 = vmatpush1.bf16.msra.mxu1 %v733_v19  ;;  %v782_v53 = vld [vmem:[#allocation5 + $0x1a4] ss:$16 sps:$4 sm:$0xff]   ;;  %v784_v54 = vld [vmem:[#allocation5 + $0x1ac] ss:$16 sps:$4 sm:$0xff]   ;;  %v786_v55 = vld [vmem:[#allocation5 + $0x1a0] ss:$16 sps:$4 sm:$0xff]  }
  0x3a   :  { %471 = vmatprep.subr.bf16.mxu0 %v734_v20  ;;  %514 = vmatprep.subr.bf16.mxu1 %v736_v21  ;;  %v787_v56 = vld [vmem:[#allocation5 + $0x1a8] ss:$16 sps:$4 sm:$0xff]   ;;  %v788_v57 = vld [vmem:[#allocation5 + $0x1c4] ss:$16 sps:$4 sm:$0xff]   ;;  %v790_v58 = vld [vmem:[#allocation5 + $0x1cc] ss:$16 sps:$4 sm:$0xff]  }
  0x3b   :  { %v792_v59 = vld [vmem:[#allocation5 + $0x1c0] ss:$16 sps:$4 sm:$0xff]   ;;  %v793_v60 = vld [vmem:[#allocation5 + $0x1c8] ss:$16 sps:$4 sm:$0xff]   ;;  %v794_v61 = vld [vmem:[#allocation5 + $0x1e4] ss:$16 sps:$4 sm:$0xff]  }
  0x3c   :  { %v796_v62 = vld [vmem:[#allocation5 + $0x1ec] ss:$16 sps:$4 sm:$0xff]   ;;  %v798_v63 = vld [vmem:[#allocation5 + $0x1e0] ss:$16 sps:$4 sm:$0xff]   ;;  %v799_v0 = vld [vmem:[#allocation5 + $0x1e8] ss:$16 sps:$4 sm:$0xff]  }
  0x3d   :  { %472 = vmatpush1.bf16.msra.mxu0 %v738_v22  ;;  %515 = vmatpush1.bf16.msra.mxu1 %v739_v23  ;;  %v800_v1 = vld [vmem:[#allocation2] ss:$8 sps:$4 sm:$0xff]   ;;  %v112_v3 = vshrl.u32 %v111_v2, 7 }
  0x3e   :  { %473 = vmatprep.subr.bf16.mxu0 %v740_v24  ;;  %516 = vmatprep.subr.bf16.mxu1 %v742_v25  ;;  %v109_v6 = vld [vmem:[%s965_s2] sm:$0xf]  ;;  %s901_s2 = smov [#allocation7]  }
  0x3f   :  { %v113_v4 = vsub.s32 0, %v112_v3  ;;  %v121_v5 = vsub.s32 2, %v112_v3  ;;  %v117_v7 = vsub.s32 1, %v112_v3  ;;  %v125_v8 = vsub.s32 3, %v112_v3  ;;  %s616_s13 = sshll.u32 %s901_s2, 4  ;;  %s617_s13 = int_to_ptr.vmem [resolvable:$true] %s616_s13 }
  0x40   :  { %s867_s14 = scalar_lea.vmem %s617_s13, 1024  ;;  %p872_p3 = scmp.lt.s32.totalorder %s617_s13, %s617_s13 }
  0x41   :  { %474 = vmatpush1.bf16.msra.mxu0 %v744_v26  ;;  %517 = vmatpush1.bf16.msra.mxu1 %v745_v27  ;;  %v114_v9 = vrot.slane %v109_v6, %v113_v4  ;;  %v122_v10 = vrot.slane %v109_v6, %v121_v5  ;;  %v118_v11 = vrot.slane %v109_v6, %v117_v7  ;;  %p868_p2 = scmp.ne.s32.totalorder %s617_s13, %s867_s14  ;;  %p873_p4 = scmp.lt.s32.totalorder %s867_s14, %s867_s14 }
  0x42   :  { %475 = vmatprep.subr.bf16.mxu0 %v746_v28  ;;  %518 = vmatprep.subr.bf16.mxu1 %v748_v29  ;;  %v126_v12 = vrot.slane %v109_v6, %v125_v8 }
  0x43   :  { %p874_p5 = por %p873_p4, %p872_p3 }
  0x45   :  { %476 = vmatpush1.bf16.msra.mxu0 %v750_v30  ;;  %519 = vmatpush1.bf16.msra.mxu1 %v751_v31  ;;  %p875_p6 = pnand %p874_p5, %p868_p2 }
  0x46   :  { %477 = vmatprep.subr.bf16.mxu0 %v752_v32  ;;  %520 = vmatprep.subr.bf16.mxu1 %v754_v33 }
  0x49   :  { %478 = vmatpush1.bf16.msra.mxu0 %v756_v34  ;;  %521 = vmatpush1.bf16.msra.mxu1 %v757_v35 }
  0x4a   :  { %479 = vmatprep.subr.bf16.mxu0 %v758_v36  ;;  %522 = vmatprep.subr.bf16.mxu1 %v760_v37 }
  0x4d   :  { %480 = vmatpush1.bf16.msra.mxu0 %v762_v38  ;;  %523 = vmatpush1.bf16.msra.mxu1 %v763_v39 }
  0x4e   :  { %481 = vmatprep.subr.bf16.mxu0 %v764_v40  ;;  %524 = vmatprep.subr.bf16.mxu1 %v766_v41 }
  0x51   :  { %482 = vmatpush1.bf16.msra.mxu0 %v768_v42  ;;  %525 = vmatpush1.bf16.msra.mxu1 %v769_v43 }
  0x52   :  { %483 = vmatprep.subr.bf16.mxu0 %v770_v44  ;;  %526 = vmatprep.subr.bf16.mxu1 %v772_v45 }
  0x55   :  { %484 = vmatpush1.bf16.msra.mxu0 %v774_v47  ;;  %527 = vmatpush1.bf16.msra.mxu1 %v775_v48 }
  0x56   :  { %485 = vmatprep.subr.bf16.mxu0 %v776_v49  ;;  %528 = vmatprep.subr.bf16.mxu1 %v778_v50 }
  0x59   :  { %486 = vmatpush1.bf16.msra.mxu0 %v780_v51  ;;  %529 = vmatpush1.bf16.msra.mxu1 %v781_v52 }
  0x5a   :  { %487 = vmatprep.subr.bf16.mxu0 %v782_v53  ;;  %530 = vmatprep.subr.bf16.mxu1 %v784_v54 }
  0x5d   :  { %488 = vmatpush1.bf16.msra.mxu0 %v786_v55  ;;  %531 = vmatpush1.bf16.msra.mxu1 %v787_v56 }
  0x5e   :  { %489 = vmatprep.subr.bf16.mxu0 %v788_v57  ;;  %532 = vmatprep.subr.bf16.mxu1 %v790_v58 }
  0x61   :  { %490 = vmatpush1.bf16.msra.mxu0 %v792_v59  ;;  %533 = vmatpush1.bf16.msra.mxu1 %v793_v60 }
  0x62   :  { %491 = vmatprep.subr.bf16.mxu0 %v794_v61  ;;  %534 = vmatprep.subr.bf16.mxu1 %v796_v62 }
  0x65   :  { %492 = vmatpush1.bf16.msra.mxu0 %v798_v63  ;;  %535 = vmatpush1.bf16.msra.mxu1 %v799_v0 }
  0x68   :  { %494 = vmatmul.mubr.bf16.vlgmr.msra.gmra.mrb[0].mxu0 %v800_v1  ;;  %537 = vmatmul.mubr.bf16.vlgmr.msra.gmra.mrb[0].mxu1 %v800_v1 }
 0x13b   :  { %v495_v13 = vpop.f32.mrb[0].mxu0  ;;  %v538_v14 = vpop.f32.mrb[0].mxu1 }
 0x13c   :  { %v496_v15 = vadd.f32 %v495_v13, %v114_v9  ;;  %v539_v16 = vadd.f32 %v538_v14, %v122_v10  ;;  %v497_v17 = vpop.f32.mrb[1].mxu0  ;;  %v540_v18 = vpop.f32.mrb[1].mxu1 }
 0x13d   :  { %v498_v19 = vadd.f32 %v497_v17, %v118_v11  ;;  %v541_v20 = vadd.f32 %v540_v18, %v126_v12  ;;  %v499_v21 = vpop.f32.mrb[2].mxu0  ;;  %v542_v22 = vpop.f32.mrb[2].mxu1 }
 0x13e   :  { %v500_v23 = vadd.f32 %v499_v21, %v114_v9  ;;  %v543_v24 = vadd.f32 %v542_v22, %v122_v10  ;;  %v501_v25 = vpop.f32.mrb[3].mxu0  ;;  %v544_v26 = vpop.f32.mrb[3].mxu1  ;;  %v547_v27 = vmax.f32 %v496_v15, %v539_v16 }
 0x13f   :  { %v502_v28 = vadd.f32 %v501_v25, %v118_v11  ;;  %v545_v29 = vadd.f32 %v544_v26, %v126_v12  ;;  %v548_v30 = vmax.f32 %v498_v19, %v541_v20 }
 0x140   :  { %v552_v31 = vmax.f32 %v500_v23, %v543_v24 }
 0x141   :  { %v553_v32 = vmax.f32 %v502_v28, %v545_v29  ;;  %v549_v33 = vmax.f32 %v547_v27, %v548_v30 }
 0x143   :  { %550 = vmax.xlane.f32.xlu0 %v549_v33  ;;  %v554_v34 = vmax.f32 %v552_v31, %v553_v32 }
 0x147   :  { %555 = vmax.xlane.f32.xlu0 %v554_v34 }
 0x1d0   :  { %v551_v35 = vpop.xlane.xlu0 %550 }
 0x1d1   :  { %v557_v36 = vsub.f32 %v496_v15, %v551_v35  ;;  %v558_v37 = vsub.f32 %v498_v19, %v551_v35  ;;  %v559_v38 = vsub.f32 %v539_v16, %v551_v35  ;;  %v560_v39 = vsub.f32 %v541_v20, %v551_v35 }
 0x1d3   :  { %v565_v40 = vmul.f32 1.442695, %v557_v36  ;;  %v567_v41 = vmul.f32 1.442695, %v558_v37  ;;  %v569_v42 = vmul.f32 1.442695, %v559_v38 }
 0x1d4   :  { %v571_v43 = vmul.f32 1.442695, %v560_v39  ;;  %v556_v44 = vpop.xlane.xlu0 %555 }
 0x1d5   :  { %803 = vpow2.f32 %v565_v40  ;;  %v561_v45 = vsub.f32 %v500_v23, %v556_v44  ;;  %v562_v46 = vsub.f32 %v502_v28, %v556_v44  ;;  %v563_v47 = vsub.f32 %v543_v24, %v556_v44 }
 0x1d6   :  { %805 = vpow2.f32 %v567_v41  ;;  %v564_v48 = vsub.f32 %v545_v29, %v556_v44 }
 0x1d7   :  { %807 = vpow2.f32 %v569_v42  ;;  %v573_v49 = vmul.f32 1.442695, %v561_v45  ;;  %v575_v50 = vmul.f32 1.442695, %v562_v46  ;;  %v577_v51 = vmul.f32 1.442695, %v563_v47 }
 0x1d8   :  { %809 = vpow2.f32 %v571_v43  ;;  %v579_v52 = vmul.f32 1.442695, %v564_v48 }
 0x1d9   :  { %811 = vpow2.f32 %v573_v49 }
 0x1da   :  { %813 = vpow2.f32 %v575_v50 }
 0x1db   :  { %815 = vpow2.f32 %v577_v51 }
 0x1dc   :  { %817 = vpow2.f32 %v579_v52 }
 0x1df   :  { %v804_v53 = vpop.eup %803 }
 0x1e0   :  { %v806_v54 = vpop.eup %805 }
 0x1e1   :  { %v808_v55 = vpop.eup %807  ;;  %v581_v56 = vadd.f32 %v806_v54, %v804_v53 }
 0x1e2   :  { %v810_v57 = vpop.eup %809 }
 0x1e3   :  { %v812_v58 = vpop.eup %811  ;;  %v582_v59 = vadd.f32 %v808_v55, %v581_v56 }
 0x1e4   :  { %v814_v60 = vpop.eup %813 }
 0x1e5   :  { %v583_v61 = vadd.f32 %v810_v57, %v582_v59  ;;  %v586_v62 = vadd.f32 %v814_v60, %v812_v58  ;;  %v816_v63 = vpop.eup %815 }
 0x1e6   :  { %v818_v1 = vpop.eup %817 }
 0x1e7   :  { %584 = vadd.xlane.f32.xlu1 %v583_v61  ;;  %v587_v0 = vadd.f32 %v816_v63, %v586_v62 }
 0x1e9   :  { %v588_v2 = vadd.f32 %v818_v1, %v587_v0 }
 0x1eb   :  { %589 = vadd.xlane.f32.xlu1 %v588_v2 }
 0x274   :  { %v585_v3 = vpop.xlane.xlu1 %584 }
 0x275   :  { %819 = vlog2.f32 %v585_v3 }
 0x278   :  { %v590_v4 = vpop.xlane.xlu1 %589 }
 0x279   :  { %821 = vlog2.f32 %v590_v4 }
 0x27f   :  { %v820_v5 = vpop.eup %819 }
 0x280   :  { %v592_v6 = vmul.f32 0.6931472, %v820_v5 }
 0x282   :  { %v595_v7 = vsub.f32 %v557_v36, %v592_v6  ;;  %v596_v8 = vsub.f32 %v558_v37, %v592_v6  ;;  %v597_v9 = vsub.f32 %v559_v38, %v592_v6  ;;  %v598_v10 = vsub.f32 %v560_v39, %v592_v6 }
 0x283   :  { %v822_v11 = vpop.eup %821 }
 0x284   :  { %603 = vst [vmem:[#allocation7] sm:$0xff] %v595_v7  ;;  %604 = vst [vmem:[#allocation7 + $0x8] sm:$0xff] %v596_v8  ;;  %v594_v12 = vmul.f32 0.6931472, %v822_v11 }
 0x285   :  { %605 = vst [vmem:[#allocation7 + $0x10] sm:$0xff] %v597_v9  ;;  %606 = vst [vmem:[#allocation7 + $0x18] sm:$0xff] %v598_v10 }
 0x286   :  { %v599_v13 = vsub.f32 %v561_v45, %v594_v12  ;;  %v600_v14 = vsub.f32 %v562_v46, %v594_v12  ;;  %v601_v15 = vsub.f32 %v563_v47, %v594_v12  ;;  %v602_v16 = vsub.f32 %v564_v48, %v594_v12 }
 0x288   :  { %607 = vst [vmem:[#allocation7 + $0x20] sm:$0xff] %v599_v13  ;;  %608 = vst [vmem:[#allocation7 + $0x28] sm:$0xff] %v600_v14 }
 0x289   :  { %609 = vst [vmem:[#allocation7 + $0x30] sm:$0xff] %v601_v15  ;;  %610 = vst [vmem:[#allocation7 + $0x38] sm:$0xff] %v602_v16 }
 0x28a   :  { %878 = shalt.err (!%p875_p6)
}
 0x28b   :  { %s879_s17 = scalar_lea.hbm %s966_s3, 1024 }
 0x28c   :  { %p880_p7 = scmp.ne.s32.totalorder %s966_s3, %s879_s17  ;;  %p883_p8 = scmp.lt.u32.totalorder %s879_s17, %s966_s3 }
 0x28e   :  { %p885_p9 = pnand %p883_p8, %p880_p7 }
 0x290   :  { %888 = shalt.err (!%p885_p9)
}
 0x291   :  { %s902_s22 = smov 512   ;;  %s903_s23 = smov 32  }
 0x292   :  { %622 = dma.vmem_to_hbm [thread:$0]  %s617_s13, 1024, %s966_s3, [#allocation4], %s902_s22, %s902_s22, %s903_s23  }
 0x293   :  { %893 = dma.done.wait [#allocation4], 1024  }
 0x294   :  { %894 = vsyncadd [#allocation4], 4294966272 }
 0x295   :  { %626 = vsyncpa [#allocation3], 1 }
 0x296   :  { %627 = vsyncpa [#allocation6], 1 }
 0x297   :  { %628 = vsyncpa [#allocation4], 1 }

</bundles_post_ra>
